<compile_context>
chip_gen: v7x
topology: tpu7x:2x2x1
jax: 0.10.0
libtpu: 0.0.40
codegen_flags: <defaults>
</compile_context>

<pallas_src>
import functools

import jax
import jax.numpy as jnp
from jax import lax
from jax.experimental import pallas as pl
from jax.experimental.pallas import tpu as pltpu


def _pick_tile(dim, max_tile, granule):
    """Largest multiple of `granule` that divides `dim`, capped at `max_tile`.

    Falls back to the full dimension (always a legal block extent) when no
    such multiple exists.
    """
    t = min(max_tile, dim)
    t -= t % granule
    while t >= granule:
        if dim % t == 0:
            return t
        t -= granule
    return dim


@functools.lru_cache(maxsize=None)
def _vmem_limit_bytes():
    """Per-generation scoped-VMEM limit with headroom for Mosaic scratch."""
    try:
        phys = int(pltpu.get_tpu_info().vmem_capacity_bytes)
    except Exception:
        phys = 128 * 1024 * 1024
    # ~5/8 of physical: 40 MiB on v7x (64 MiB/TC), 80 MiB on v5e/v6e (128 MiB).
    return min((phys * 5) // 8, 96 * 1024 * 1024)


# ----------------------------------------------------------------------------
# Kernel 1: tiled dense layer  o = x @ w + b   (w is bf16, acc is f32)
# ----------------------------------------------------------------------------
def _linear_kernel(x_ref, w_ref, b_ref, o_ref, acc_ref):
    k = pl.program_id(2)

    @pl.when(k == 0)
    def _():
        acc_ref[...] = jnp.zeros_like(acc_ref)

    x = x_ref[...]
    if x.dtype != jnp.bfloat16:          # only the f32 module inputs need a cast
        x = x.astype(jnp.bfloat16)
    acc_ref[...] += jnp.dot(x, w_ref[...], preferred_element_type=jnp.float32)

    @pl.when(k == pl.num_programs(2) - 1)
    def _():
        o_ref[...] = (acc_ref[...] + b_ref[...]).astype(o_ref.dtype)


def pallas_linear(x, w, b, out_dtype=None):
    """x: (M, K) f32/bf16, w: (K, N) bf16, b: (N,) f32 -> (M, N) out_dtype."""
    M, K = x.shape
    K2, N = w.shape
    assert K == K2 and b.shape == (N,)
    out_dtype = x.dtype if out_dtype is None else out_dtype

    tm = _pick_tile(M, 1024, 8)
    tn = _pick_tile(N, 1024, 128)
    tk = _pick_tile(K, 512, 128)
    grid = (M // tm, N // tn, K // tk)

    cost = pl.CostEstimate(
        flops=2 * M * N * K,
        transcendentals=0,
        bytes_accessed=int(
            M * K * x.dtype.itemsize
            + K * N * w.dtype.itemsize
            + N * b.dtype.itemsize
            + M * N * jnp.dtype(out_dtype).itemsize
        ),
    )

    return pl.pallas_call(
        _linear_kernel,
        out_shape=jax.ShapeDtypeStruct((M, N), out_dtype),
        grid_spec=pltpu.PrefetchScalarGridSpec(
            num_scalar_prefetch=0,
            grid=grid,
            in_specs=[
                pl.BlockSpec((tm, tk), lambda i, j, k: (i, k)),
                pl.BlockSpec((tk, tn), lambda i, j, k: (k, j)),
                pl.BlockSpec((1, tn), lambda i, j, k: (0, j)),
            ],
            out_specs=pl.BlockSpec((tm, tn), lambda i, j, k: (i, j)),
            scratch_shapes=[pltpu.VMEM((tm, tn), jnp.float32)],
        ),
        compiler_params=pltpu.CompilerParams(
            dimension_semantics=("parallel", "parallel", "arbitrary"),
            vmem_limit_bytes=_vmem_limit_bytes(),
        ),
        cost_estimate=cost,
    )(x, w, b.reshape(1, N))


# ----------------------------------------------------------------------------
# Kernel 2: cross-attention, flash-style online softmax over Tk.
#   grid = (B, Tq/tq, Tk/tkv); the Tk axis is "arbitrary" (accumulator axis).
#   q_ref : (1, tq,  C)   bf16, un-transposed query projection (scale folded in)
#   kv_ref: (1, tkv, 2C)  bf16, un-transposed fused k/v projection tile
#   o_ref : (1, tq,  C)   bf16, lane-dense output slab
# Head splitting / k-v chunking is done with static lane slices in-kernel,
# matching: kv.reshape(B,T,H,2hs).permute(0,2,1,3).chunk(2, -1).
# ----------------------------------------------------------------------------
def _attn_kernel(q_ref, kv_ref, o_ref, m_sc, l_sc, acc_sc, *, n_heads, head_size):
    kv_i = pl.program_id(2)

    @pl.when(kv_i == 0)
    def _():
        m_sc[...] = jnp.full_like(m_sc, -jnp.inf)
        l_sc[...] = jnp.zeros_like(l_sc)
        acc_sc[...] = jnp.zeros_like(acc_sc)

    q_all = q_ref[0]      # (tq,  C)  bf16 (already scaled by 1/sqrt(hs))
    kv_all = kv_ref[0]    # (tkv, 2C) bf16

    for h in range(n_heads):  # static unroll; per-head temporaries die each iter
        qh = q_all[:, h * head_size:(h + 1) * head_size]
        kh = kv_all[:, (2 * h) * head_size:(2 * h + 1) * head_size]
        vh = kv_all[:, (2 * h + 1) * head_size:(2 * h + 2) * head_size]

        # scores: contract the head dim of both operands directly (no .T)
        s = lax.dot_general(qh, kh, (((1,), (1,)), ((), ())),
                            preferred_element_type=jnp.float32)      # (tq, tkv)

        m_prev = m_sc[h]                                             # (tq, 1)
        l_prev = l_sc[h]
        m_new = jnp.maximum(m_prev, jnp.max(s, axis=-1, keepdims=True))
        alpha = jnp.exp(m_prev - m_new)                              # (tq, 1)
        p = jnp.exp(s - m_new)                                       # unnormalized
        m_sc[h] = m_new
        l_sc[h] = alpha * l_prev + jnp.sum(p, axis=-1, keepdims=True)

        sl = slice(h * head_size, (h + 1) * head_size)
        acc_sc[:, sl] = alpha * acc_sc[:, sl] + jnp.dot(
            p.astype(jnp.bfloat16), vh, preferred_element_type=jnp.float32)

    @pl.when(kv_i == pl.num_programs(2) - 1)
    def _():
        # Normalize AFTER the PV matmul: one (tq, hs) multiply per head on the
        # EUP reciprocal, then a single lane-dense (tq, C) writeback.
        for h in range(n_heads):
            sl = slice(h * head_size, (h + 1) * head_size)
            acc_sc[:, sl] = acc_sc[:, sl] * pl.reciprocal(l_sc[h], approx=True)
        o_ref[0] = acc_sc[...].astype(o_ref.dtype)


def pallas_cross_attention(q_proj, kv_proj, n_heads):
    """q_proj: (B, Tq, C) bf16, kv_proj: (B, Tk, 2C) bf16 -> (B, Tq, C) bf16."""
    B, Tq, C = q_proj.shape
    Bk, Tk, C2 = kv_proj.shape
    assert B == Bk and C2 == 2 * C
    assert C % n_heads == 0, "n_embd % n_heads != 0"
    head_size = C // n_heads

    tq = _pick_tile(Tq, 512, 8)
    tkv = _pick_tile(Tk, 512, 8)
    grid = (B, Tq // tq, Tk // tkv)

    cost = pl.CostEstimate(
        flops=4 * B * n_heads * Tq * Tk * head_size,
        transcendentals=B * n_heads * Tq * Tk,
        bytes_accessed=int(
            B * Tq * C * q_proj.dtype.itemsize
            + B * Tk * C2 * kv_proj.dtype.itemsize
            + B * Tq * C * 2
        ),
    )

    kernel = functools.partial(_attn_kernel, n_heads=n_heads, head_size=head_size)
    return pl.pallas_call(
        kernel,
        out_shape=jax.ShapeDtypeStruct((B, Tq, C), jnp.bfloat16),
        grid_spec=pltpu.PrefetchScalarGridSpec(
            num_scalar_prefetch=0,
            grid=grid,
            in_specs=[
                pl.BlockSpec((1, tq, C), lambda b, i, j: (b, i, 0)),
                pl.BlockSpec((1, tkv, C2), lambda b, i, j: (b, j, 0)),
            ],
            out_specs=pl.BlockSpec((1, tq, C), lambda b, i, j: (b, i, 0)),
            scratch_shapes=[
                pltpu.VMEM((n_heads, tq, 1), jnp.float32),   # running max  m
                pltpu.VMEM((n_heads, tq, 1), jnp.float32),   # running sum  l
                pltpu.VMEM((tq, C), jnp.float32),            # per-head out acc
            ],
        ),
        compiler_params=pltpu.CompilerParams(
            dimension_semantics=("parallel", "parallel", "arbitrary"),
            vmem_limit_bytes=_vmem_limit_bytes(),
        ),
        cost_estimate=cost,
    )(q_proj, kv_proj)


# ----------------------------------------------------------------------------
# Module wrapper (mirrors the PyTorch forward pass)
# ----------------------------------------------------------------------------
def init_params(key, n_embd):
    k1, k2, k3, k4, k5, k6 = jax.random.split(key, 6)
    s = 0.02
    return {
        # PyTorch Linear stores W as (out, in); we keep (in, out) for x @ W.
        "w_kv": jax.random.normal(k1, (n_embd, 2 * n_embd), jnp.float32) * s,
        "b_kv": jax.random.normal(k2, (2 * n_embd,), jnp.float32) * s,
        "w_q": jax.random.normal(k3, (n_embd, n_embd), jnp.float32) * s,
        "b_q": jax.random.normal(k4, (n_embd,), jnp.float32) * s,
        "w_o": jax.random.normal(k5, (n_embd, n_embd), jnp.float32) * s,
        "b_o": jax.random.normal(k6, (n_embd,), jnp.float32) * s,
    }


def prepare_params(params, n_heads):
    """One-time prep: bf16 MXU weights; 1/sqrt(head_size) folded into q proj."""
    n_embd = params["w_q"].shape[0]
    assert n_embd % n_heads == 0, "n_embd % n_heads != 0"
    scale = 1.0 / ((n_embd // n_heads) ** 0.5)
    return {
        "w_kv": params["w_kv"].astype(jnp.bfloat16),
        "b_kv": params["b_kv"],
        "w_q": (params["w_q"] * scale).astype(jnp.bfloat16),
        "b_q": params["b_q"] * scale,
        "w_o": params["w_o"].astype(jnp.bfloat16),
        "b_o": params["b_o"],
    }


def multi_head_cross_attention(prepared, enc, dec, n_heads):
    B, Te, C = enc.shape
    Bd, Td, Cd = dec.shape
    assert B == Bd and C == Cd, "enc/dec batch or embed dim mismatch"
    assert C % n_heads == 0, "n_embd % n_heads != 0"

    # projections (tiled Pallas linears on flattened (B*T, C)); bf16 outputs
    kv = pallas_linear(enc.reshape(B * Te, C), prepared["w_kv"], prepared["b_kv"],
                       out_dtype=jnp.bfloat16)
    q = pallas_linear(dec.reshape(B * Td, C), prepared["w_q"], prepared["b_q"],
                      out_dtype=jnp.bfloat16)

    # Only free row-major reshapes here — no transposes / chunk slices in HBM;
    # the attention kernel indexes heads and k/v halves internally.
    # TODO(synk): fuse the q projection (dec_tile @ w_q, w_q is VMEM-resident)
    # into the attention kernel to remove one (B,Tq,C) HBM round trip.
    kv = kv.reshape(B, Te, 2 * C)
    q = q.reshape(B, Td, C)

    vals = pallas_cross_attention(q, kv, n_heads)          # (B, Td, C) bf16

    out = pallas_linear(vals.reshape(B * Td, C), prepared["w_o"], prepared["b_o"],
                        out_dtype=jnp.float32)
    return out.reshape(B, Td, C)


# pure-JAX reference (mirrors the PyTorch module) for a correctness check
def _reference(params, enc, dec, n_heads):
    B, T, C = enc.shape
    hs = C // n_heads
    kv = enc @ params["w_kv"] + params["b_kv"]
    q = dec @ params["w_q"] + params["b_q"]
    kv = kv.reshape(B, T, n_heads, 2 * hs).transpose(0, 2, 1, 3)
    k, v = kv[..., :hs], kv[..., hs:]
    q = q.reshape(B, dec.shape[1], n_heads, hs).transpose(0, 2, 1, 3)
    s = jnp.einsum("bhqd,bhkd->bhqk", q, k) / (hs ** 0.5)
    p = jax.nn.softmax(s, axis=-1)
    vals = jnp.einsum("bhqk,bhkd->bhqd", p, v)
    vals = vals.transpose(0, 2, 1, 3).reshape(B, dec.shape[1], C)
    return vals @ params["w_o"] + params["b_o"]


if __name__ == "__main__":
    B, T, C, H = 2, 8, 32, 4   # batch, seq, n_embd, n_heads
    key = jax.random.PRNGKey(0)
    kp, ke, kd = jax.random.split(key, 3)
    params = init_params(kp, C)
    prepared = prepare_params(params, H)
    enc = jax.random.normal(ke, (B, T, C), jnp.float32)
    dec = jax.random.normal(kd, (B, T, C), jnp.float32)

    out = multi_head_cross_attention(prepared, enc, dec, H)
    out = jax.block_until_ready(out)

    ref = _reference(params, enc, dec, H)
    assert out.shape == (B, T, C)
    # bf16 weights/intermediates + approx reciprocal -> tolerance looser than f32
    err = float(jnp.max(jnp.abs(out - ref)))
    assert err < 2e-2, f"mismatch vs reference: max abs err {err}"
    print("KERNEL_OK")
</pallas_src>

<mosaic_0001>
module attributes {stable_mosaic.version = 11 : i64} {
  func.func @_linear_kernel(%arg0: i32, %arg1: i32, %arg2: i32, %arg3: memref<16x32xf32, #tpu.memory_space<vmem>>, %arg4: memref<32x64xbf16, #tpu.memory_space<vmem>>, %arg5: memref<1x64xf32, #tpu.memory_space<vmem>>, %arg6: memref<16x64xbf16, #tpu.memory_space<vmem>>, %arg7: memref<16x64xf32, #tpu.memory_space<vmem>>) attributes {dimension_semantics = [#tpu.dimension_semantics<parallel>, #tpu.dimension_semantics<parallel>, #tpu.dimension_semantics<arbitrary>], iteration_bounds = array<i64: 1, 1, 1>, scalar_prefetch = 0 : i64, scratch_operands = 1 : i64, tpu.core_type = #tpu.core_type<tc>, window_params = [{transform_indices = @transform_0, window_bounds = array<i64: 16, 32>}, {transform_indices = @transform_1, window_bounds = array<i64: 32, 64>}, {transform_indices = @transform_2, window_bounds = array<i64: 1, 64>}, {transform_indices = @transform_3, window_bounds = array<i64: 16, 64>}]} {
    %c0_i32 = arith.constant 0 : i32
    %0 = arith.cmpi eq, %arg2, %c0_i32 : i32
    %1 = arith.extui %0 : i1 to i32
    %c0_i32_0 = arith.constant 0 : i32
    %2 = arith.cmpi ne, %1, %c0_i32_0 : i32
    scf.if %2 {
      %cst_10 = arith.constant 0.000000e+00 : f32
      %13 = vector.broadcast %cst_10 : f32 to vector<16x64xf32>
      %c0_11 = arith.constant 0 : index
      %c0_12 = arith.constant 0 : index
      %14 = vector.load %arg7[%c0_11, %c0_12] : memref<16x64xf32, #tpu.memory_space<vmem>>, vector<16x64xf32>
      tpu.vector_store %arg7[%c0_11, %c0_12], %13 {strides = array<i32>} : memref<16x64xf32, #tpu.memory_space<vmem>>, vector<16x64xf32>,
    } else {
    }
    %c0 = arith.constant 0 : index
    %c0_1 = arith.constant 0 : index
    %3 = vector.load %arg3[%c0, %c0_1] : memref<16x32xf32, #tpu.memory_space<vmem>>, vector<16x32xf32>
    %4 = arith.truncf %3 : vector<16x32xf32> to vector<16x32xbf16>
    %c0_2 = arith.constant 0 : index
    %c0_3 = arith.constant 0 : index
    %5 = vector.load %arg7[%c0_2, %c0_3] : memref<16x64xf32, #tpu.memory_space<vmem>>, vector<16x64xf32>
    %c0_4 = arith.constant 0 : index
    %c0_5 = arith.constant 0 : index
    %6 = vector.load %arg4[%c0_4, %c0_5] : memref<32x64xbf16, #tpu.memory_space<vmem>>, vector<32x64xbf16>
    %cst = arith.constant dense<0.000000e+00> : vector<16x64xf32>
    %7 = tpu.matmul %4, %6, %cst {dimension_numbers = #tpu.dot_dimension_numbers<[1], [0], [0], [1], [0, 0, 1, 1], [], []>} : vector<16x32xbf16>, vector<32x64xbf16>, vector<16x64xf32> -> vector<16x64xf32>
    %8 = arith.addf %5, %7 : vector<16x64xf32>
    %c0_6 = arith.constant 0 : index
    %c0_7 = arith.constant 0 : index
    %9 = vector.load %arg7[%c0_6, %c0_7] : memref<16x64xf32, #tpu.memory_space<vmem>>, vector<16x64xf32>
    tpu.vector_store %arg7[%c0_6, %c0_7], %8 {strides = array<i32>} : memref<16x64xf32, #tpu.memory_space<vmem>>, vector<16x64xf32>,
    %c0_i32_8 = arith.constant 0 : i32
    %10 = arith.cmpi eq, %arg2, %c0_i32_8 : i32
    %11 = arith.extui %10 : i1 to i32
    %c0_i32_9 = arith.constant 0 : i32
    %12 = arith.cmpi ne, %11, %c0_i32_9 : i32
    scf.if %12 {
      %c0_10 = arith.constant 0 : index
      %c0_11 = arith.constant 0 : index
      %13 = vector.load %arg7[%c0_10, %c0_11] : memref<16x64xf32, #tpu.memory_space<vmem>>, vector<16x64xf32>
      %c0_12 = arith.constant 0 : index
      %c0_13 = arith.constant 0 : index
      %14 = vector.load %arg5[%c0_12, %c0_13] : memref<1x64xf32, #tpu.memory_space<vmem>>, vector<1x64xf32>
      %15 = vector.broadcast %14 : vector<1x64xf32> to vector<16x64xf32>
      %16 = arith.addf %13, %15 : vector<16x64xf32>
      %17 = arith.truncf %16 : vector<16x64xf32> to vector<16x64xbf16>
      %c0_14 = arith.constant 0 : index
      %c0_15 = arith.constant 0 : index
      %18 = vector.load %arg6[%c0_14, %c0_15] : memref<16x64xbf16, #tpu.memory_space<vmem>>, vector<16x64xbf16>
      tpu.vector_store %arg6[%c0_14, %c0_15], %17 {strides = array<i32>} : memref<16x64xbf16, #tpu.memory_space<vmem>>, vector<16x64xbf16>,
    } else {
    }
    return
  }
  func.func @transform_0(%arg0: i32, %arg1: i32, %arg2: i32) -> (i32, i32) {
    %c0_i32 = arith.constant 0 : i32
    return %arg0, %arg2 : i32, i32
  }
  func.func @transform_1(%arg0: i32, %arg1: i32, %arg2: i32) -> (i32, i32) {
    %c0_i32 = arith.constant 0 : i32
    return %arg2, %arg1 : i32, i32
  }
  func.func @transform_2(%arg0: i32, %arg1: i32, %arg2: i32) -> (i32, i32) {
    %c0_i32 = arith.constant 0 : i32
    %c0_i32_0 = arith.constant 0 : i32
    return %c0_i32, %arg1 : i32, i32
  }
  func.func @transform_3(%arg0: i32, %arg1: i32, %arg2: i32) -> (i32, i32) {
    %c0_i32 = arith.constant 0 : i32
    return %arg0, %arg1 : i32, i32
  }
}

</mosaic_0001>

<bundles_post_ra>
// kernel: tpu_custom_call.1
= control target key start
LH: loop header
LB: loop body
LE: loop exit
PB: predicated region body
PF: predicated region fallthrough
CT: control target
= control target key end

     0   :  { %8 = vsyncpa [#allocation4], 0  ;;  %s389_s0 = inlined_call_operand.hbm [shape: f32[16,32], index: 0, kind: input, shape index: {}]   ;;  %s390_s1 = inlined_call_operand.hbm [shape: bf16[32,64], index: 1, kind: input, shape index: {}]   ;;  %s391_s2 = inlined_call_operand.hbm [shape: f32[1,64], index: 2, kind: input, shape index: {}]   ;;  %s392_s3 = inlined_call_operand.hbm [shape: bf16[16,64], index: 3, kind: output, shape index: {}]  }
   0x1   :  { %9 = vsyncpa [#allocation7], 0 }
   0x2   :  { %10 = vsyncpa [#allocation5], 0  ;;  %s301_s12 = smov [#allocation6]   ;;  %s207_s16 = scalar_lea.hbm %s390_s1, 256 }
   0x3   :  { %s28_s13 = sshll.u32 %s301_s12, 4  ;;  %p208_p0 = scmp.ne.s32.totalorder %s390_s1, %s207_s16  ;;  %s29_s13 = int_to_ptr.vmem [resolvable:$true] %s28_s13 }
   0x4   :  { %p211_p1 = scmp.lt.u32.totalorder %s207_s16, %s390_s1 }
   0x6   :  { %p213_p2 = pnand %p211_p1, %p208_p0 }
   0x8   :  { %216 = shalt.err (!%p213_p2)
}
   0x9   :  { %s217_s21 = scalar_lea.vmem %s29_s13, 256  ;;  %p222_p4 = scmp.lt.s32.totalorder %s29_s13, %s29_s13 }
   0xa   :  { %p218_p3 = scmp.ne.s32.totalorder %s29_s13, %s217_s21  ;;  %p223_p5 = scmp.lt.s32.totalorder %s217_s21, %s217_s21 }
   0xc   :  { %p224_p6 = por %p223_p5, %p222_p4 }
   0xe   :  { %p225_p7 = pnand %p224_p6, %p218_p3 }
  0x10   :  { %228 = shalt.err (!%p225_p7)
}
  0x11   :  { %s302_s22 = smov 64   ;;  %s303_s23 = smov 4  }
  0x12   :  { %34 = dma.hbm_to_vmem [thread:$0]  %s390_s1, 256, %s29_s13, [#allocation7], %s302_s22, %s302_s22, %s303_s23  }
  0x13   :  { %s304_s26 = smov [#allocation3]   ;;  %s229_s30 = scalar_lea.hbm %s389_s0, 256 }
  0x14   :  { %s16_s27 = sshll.u32 %s304_s26, 4  ;;  %p230_p8 = scmp.ne.s32.totalorder %s389_s0, %s229_s30  ;;  %s17_s27 = int_to_ptr.vmem [resolvable:$true] %s16_s27 }
  0x15   :  { %p233_p9 = scmp.lt.u32.totalorder %s229_s30, %s389_s0 }
  0x17   :  { %p235_p10 = pnand %p233_p9, %p230_p8 }
  0x19   :  { %238 = shalt.err (!%p235_p10)
}
  0x1a   :  { %s239_s8 = scalar_lea.vmem %s17_s27, 256  ;;  %p244_p12 = scmp.lt.s32.totalorder %s17_s27, %s17_s27 }
  0x1b   :  { %p240_p11 = scmp.ne.s32.totalorder %s17_s27, %s239_s8  ;;  %p245_p13 = scmp.lt.s32.totalorder %s239_s8, %s239_s8 }
  0x1d   :  { %p246_p0 = por %p245_p13, %p244_p12 }
  0x1f   :  { %p247_p1 = pnand %p246_p0, %p240_p11 }
  0x21   :  { %250 = shalt.err (!%p247_p1)
}
  0x22   :  { %s305_s1 = smov 128   ;;  %s306_s9 = smov 8  }
  0x23   :  { %22 = dma.hbm_to_vmem [thread:$0]  %s389_s0, 256, %s17_s27, [#allocation4], %s305_s1, %s305_s1, %s306_s9  }
  0x24   :  { %s307_s12 = smov [#allocation8]   ;;  %s251_s16 = scalar_lea.hbm %s391_s2, 16 }
  0x25   :  { %s41_s13 = sshll.u32 %s307_s12, 4  ;;  %p252_p2 = scmp.ne.s32.totalorder %s391_s2, %s251_s16  ;;  %s42_s13 = int_to_ptr.vmem [resolvable:$true] %s41_s13 }
  0x26   :  { %p255_p3 = scmp.lt.u32.totalorder %s251_s16, %s391_s2 }
  0x28   :  { %p257_p4 = pnand %p255_p3, %p252_p2 }
  0x2a   :  { %260 = shalt.err (!%p257_p4)
}
  0x2b   :  { %s261_s21 = scalar_lea.vmem %s42_s13, 16  ;;  %s265_s0 = scalar_lea.vmem %s42_s13, 32 }
  0x2c   :  { %p262_p5 = scmp.ne.s32.totalorder %s42_s13, %s261_s21  ;;  %p266_p6 = scmp.lt.s32.totalorder %s42_s13, %s42_s13 }
  0x2d   :  { %p267_p7 = scmp.lt.s32.totalorder %s265_s0, %s261_s21 }
  0x2f   :  { %p268_p8 = por %p267_p7, %p266_p6 }
  0x31   :  { %p269_p9 = pnand %p268_p8, %p262_p5 }
  0x33   :  { %272 = shalt.err (!%p269_p9)
}
  0x34   :  { %44 = dma.hbm_to_vmem [thread:$0]  %s391_s2, 16, %s42_s13, [#allocation7]  }
  0x35   :  { %295 = dma.done.wait [#allocation4], 256  }
  0x36   :  { %296 = vsyncadd [#allocation4], 4294967040 }
  0x37   :  { %297 = dma.done.wait [#allocation7], 272  }
  0x38   :  { %298 = vsyncadd [#allocation7], 4294967024  ;;  %vm59_vm0 = vcmask 523264   ;;  %v308_v0 = vmov 0.0   ;;  %vm309_vm1 = vmmov 0   ;;  %v205_v1 = vld [vmem:[#allocation6] sm:$0xff]  }
  0x39   :  { %60 = vst.msk [vmem:[#allocation2] sm:$0xff] %vm59_vm0, %v308_v0  ;;  %61 = vst.msk [vmem:[#allocation2 + $0x8] sm:$0xff] %vm59_vm0, %v308_v0  ;;  %187 = vmatprep.subr.bf16.mxu0 %v308_v0  ;;  %191 = vmatprep.mubr.msk.bf16.mxu0 %vm309_vm1, %v308_v0  ;;  %v206_v2 = vld [vmem:[#allocation6 + $0x8] sm:$0xff]   ;;  %v62_v3 = vld [vmem:[#allocation3] sm:$0xff]  ;;  %vm83_vm2 = vcmask 261120   ;;  %vm155_vm3 = vcmask 519168  }
  0x3a   :  { %188 = vmatpush3.bf16.msra.mxu0 %v205_v1  ;;  %v63_v4 = vld [vmem:[#allocation3 + $0x8] sm:$0xff]  ;;  %v179_v14 = vld [vmem:[#allocation8] ss:$0 sm:$0xff]  ;;  %s310_s2 = smov [#allocation9]  }
  0x3b   :  { %189 = vmatprep.subr.bf16.mxu0 %v308_v0  ;;  %v64_v5 = vpack.c.bf16 %v63_v4, %v62_v3  ;;  %s163_s26 = sshll.u32 %s310_s2, 4  ;;  %s164_s26 = int_to_ptr.vmem [resolvable:$true] %s163_s26 }
  0x3c   :  { %s273_s27 = scalar_lea.vmem %s164_s26, 128  ;;  %p278_p11 = scmp.lt.s32.totalorder %s164_s26, %s164_s26 }
  0x3d   :  { %p274_p10 = scmp.ne.s32.totalorder %s164_s26, %s273_s27  ;;  %p279_p12 = scmp.lt.s32.totalorder %s273_s27, %s273_s27 }
  0x3e   :  { %190 = vmatpush3.bf16.msra.mxu0 %v206_v2 }
  0x3f   :  { %p280_p13 = por %p279_p12, %p278_p11 }
  0x40   :  { %v65_v6 = vld [vmem:[#allocation2] sm:$0xff]  ;;  %v66_v8 = vld [vmem:[#allocation2 + $0x8] sm:$0xff] }
  0x41   :  { %192 = vmatmul.mubr.msk.bf16.vlgmr.msra.gmra.mrb[0].mxu0 %vm83_vm2, %v64_v5  ;;  %p281_p0 = pnand %p280_p13, %p274_p10 }
 0x114   :  { %v121_v7 = vpop.f32.mrb[0].mxu0 }
 0x115   :  { %v128_v9 = vadd.f32 %v121_v7, %v65_v6  ;;  %v193_v10 = vpop.f32.mrb[1].mxu0 }
 0x116   :  { %v124_v11 = vpop.f32.mrb[2].mxu0 }
 0x117   :  { %131 = vst.msk [vmem:[#allocation2] sm:$0xff] %vm59_vm0, %v128_v9  ;;  %v129_v12 = vadd.f32 %v124_v11, %v66_v8  ;;  %v194_v13 = vpop.f32.mrb[3].mxu0 }
 0x119   :  { %132 = vst.msk [vmem:[#allocation2 + $0x8] sm:$0xff] %vm59_vm0, %v129_v12 }
 0x11e   :  { %v136_v15 = vld [vmem:[#allocation2] sm:$0xff] }
 0x11f   :  { %v145_v16 = vadd.f32 %v179_v14, %v136_v15 }
 0x120   :  { %v137_v17 = vld [vmem:[#allocation2 + $0x8] sm:$0xff] }
 0x121   :  { %v146_v18 = vadd.f32 %v179_v14, %v137_v17  ;;  %v182_v19 = vpack.c.bf16 %v145_v16, %v145_v16 }
 0x123   :  { %v183_v20 = vpack.c.bf16 %v146_v18, %v146_v18  ;;  %156 = vst.msk [vmem:[#allocation9] sm:$0xf] %vm155_vm3, %v182_v19 }
 0x125   :  { %157 = vst.msk [vmem:[#allocation9 + $0x4] sm:$0xf] %vm155_vm3, %v183_v20 }
 0x126   :  { %284 = shalt.err (!%p281_p0)
}
 0x127   :  { %s285_s30 = scalar_lea.hbm %s392_s3, 128 }
 0x128   :  { %p286_p1 = scmp.ne.s32.totalorder %s392_s3, %s285_s30  ;;  %p289_p2 = scmp.lt.u32.totalorder %s285_s30, %s392_s3 }
 0x12a   :  { %p291_p3 = pnand %p289_p2, %p286_p1 }
 0x12c   :  { %294 = shalt.err (!%p291_p3)
}
 0x12d   :  { %169 = dma.vmem_to_hbm [thread:$0]  %s164_s26, 128, %s392_s3, [#allocation5], %s302_s22, %s302_s22, %s303_s23  }
 0x12e   :  { %299 = dma.done.wait [#allocation5], 128  }
 0x12f   :  { %300 = vsyncadd [#allocation5], 4294967168 }
 0x130   :  { %173 = vsyncpa [#allocation4], 1 }
 0x131   :  { %174 = vsyncpa [#allocation7], 1 }
 0x132   :  { %175 = vsyncpa [#allocation5], 1 }

</bundles_post_ra>
